<compile_context>
chip_gen: v5e
topology: v5e:2x2
jax: 0.10.0
libtpu: 0.0.40
codegen_flags: <defaults>
</compile_context>

<pallas_src>
import functools

import jax
import jax.numpy as jnp
from jax.experimental import pallas as pl
from jax.experimental.pallas import tpu as pltpu

_LANES = 128
_MAX_TILE_ROWS = 2048   # (2048, 128) f32 = 1 MiB per input per grid step
_MAX_SPLITS = 2         # leading "parallel" axis: 2 TCs on v7x; free on 1-TC chips


def _bce_kernel(p_ref, t_ref, o_ref, acc_ref, *,
                tile_rows, total_rows, tiles_per_split):
    c = pl.program_id(0)   # parallel split (megacore / v7x dual TC)
    i = pl.program_id(1)   # reduction step within this split

    @pl.when(i == 0)
    def _():
        acc_ref[...] = jnp.zeros_like(acc_ref)

    tile_idx = c * tiles_per_split + i
    row0 = tile_idx * tile_rows

    # Skip the (at most one per split) fully out-of-range duplicate tile: it
    # contributes nothing, so don't pay the log/exp for it.
    @pl.when(row0 < total_rows)
    def _():
        p = p_ref[...].astype(jnp.float32)
        t = t_ref[...].astype(jnp.float32)

        # PyTorch clamps each log term at -100 for numerical stability.
        log_p = jnp.maximum(jnp.log(p), -100.0)
        log_1mp = jnp.maximum(jnp.log(1.0 - p), -100.0)
        # -(t*log_p + (1-t)*log_1mp) rewritten with one fewer multiply.
        loss = -(log_1mp + t * (log_p - log_1mp))

        # Mask rows beyond the end of the data (ragged last tile). Garbage rows
        # (possibly NaN after log) are replaced by 0 before accumulation.
        row_ids = jax.lax.broadcasted_iota(jnp.int32, (tile_rows, _LANES), 0)
        valid = (row0 + row_ids) < total_rows

        acc_ref[...] += jnp.where(valid, loss, 0.0)   # elementwise VPU accumulation

    @pl.when(i == pl.num_programs(1) - 1)
    def _():
        # Single cross-lane/sublane reduce per split; wrapper sums the partials.
        o_ref[...] = jnp.broadcast_to(jnp.sum(acc_ref[...]), o_ref.shape)


def bce_loss(y_pred, y_true):
    """Mean-reduced binary cross entropy (nn.BCELoss) via a Pallas TPU kernel."""
    assert y_pred.shape == y_true.shape
    n_elems = y_pred.size

    p_flat = jnp.ravel(y_pred)
    t_flat = jnp.ravel(y_true)

    # Lane alignment only: pad (< 128 elems, and only when n % 128 != 0) with
    # (pred=1, true=1), which contributes exactly 0 loss.
    rem = n_elems % _LANES
    if rem:
        pad = _LANES - rem
        p_flat = jnp.pad(p_flat, (0, pad), constant_values=1.0)
        t_flat = jnp.pad(t_flat, (0, pad), constant_values=1.0)

    rows = p_flat.size // _LANES
    p2 = p_flat.reshape(rows, _LANES)
    t2 = t_flat.reshape(rows, _LANES)

    tile_rows = rows if rows <= _MAX_TILE_ROWS else _MAX_TILE_ROWS
    n_tiles = pl.cdiv(rows, tile_rows)
    num_splits = _MAX_SPLITS if n_tiles >= _MAX_SPLITS else 1
    tiles_per_split = pl.cdiv(n_tiles, num_splits)

    def in_map(c, i):
        # Clamp so the over-coverage blocks (whose contribution is skipped /
        # masked to 0 inside the kernel) always DMA an in-bounds tile.
        return (jnp.minimum(c * tiles_per_split + i, n_tiles - 1), 0)

    kernel = functools.partial(
        _bce_kernel,
        tile_rows=tile_rows,
        total_rows=rows,
        tiles_per_split=tiles_per_split,
    )

    out = pl.pallas_call(
        kernel,
        out_shape=jax.ShapeDtypeStruct((num_splits, 8, _LANES), jnp.float32),
        grid_spec=pltpu.PrefetchScalarGridSpec(
            num_scalar_prefetch=0,
            grid=(num_splits, tiles_per_split),
            in_specs=[
                pl.BlockSpec((tile_rows, _LANES), in_map),
                pl.BlockSpec((tile_rows, _LANES), in_map),
            ],
            out_specs=pl.BlockSpec((1, 8, _LANES), lambda c, i: (c, 0, 0)),
            scratch_shapes=[pltpu.VMEM((tile_rows, _LANES), jnp.float32)],
        ),
        compiler_params=pltpu.CompilerParams(
            dimension_semantics=("parallel", "arbitrary"),
        ),
    )(p2, t2)

    # One partial sum per split (broadcast over its (8,128) block); combine + mean.
    return jnp.sum(out[:, 0, 0]) / n_elems


if __name__ == "__main__":
    key = jax.random.PRNGKey(0)
    k1, k2 = jax.random.split(key)

    # Small NCHW-like shapes: batch=2, channels=4, spatial=16x16.
    shape = (2, 4, 16, 16)
    y_pred = jax.nn.sigmoid(jax.random.normal(k1, shape, dtype=jnp.float32))
    y_true = (jax.random.uniform(k2, shape) > 0.5).astype(jnp.float32)

    loss = bce_loss(y_pred, y_true)
    jax.block_until_ready(loss)

    # Reference check against plain-JAX BCE (same clamp semantics as PyTorch).
    log_p = jnp.maximum(jnp.log(y_pred), -100.0)
    log_1mp = jnp.maximum(jnp.log(1.0 - y_pred), -100.0)
    ref = jnp.mean(-(y_true * log_p + (1.0 - y_true) * log_1mp))
    assert jnp.allclose(loss, ref, rtol=1e-5, atol=1e-5), (loss, ref)

    print("KERNEL_OK")
</pallas_src>

<mosaic_0001>
module attributes {stable_mosaic.version = 11 : i64} {
  func.func @_bce_kernel(%arg0: i32, %arg1: i32, %arg2: memref<16x128xf32, #tpu.memory_space<vmem>>, %arg3: memref<16x128xf32, #tpu.memory_space<vmem>>, %arg4: memref<1x8x128xf32, #tpu.memory_space<vmem>>, %arg5: memref<16x128xf32, #tpu.memory_space<vmem>>) attributes {dimension_semantics = [#tpu.dimension_semantics<parallel>, #tpu.dimension_semantics<arbitrary>], iteration_bounds = array<i64: 1, 1>, scalar_prefetch = 0 : i64, scratch_operands = 1 : i64, tpu.core_type = #tpu.core_type<tc>, window_params = [{transform_indices = @transform_0, window_bounds = array<i64: 16, 128>}, {transform_indices = @transform_1, window_bounds = array<i64: 16, 128>}, {transform_indices = @transform_2, window_bounds = array<i64: 1, 8, 128>}]} {
    %c0_i32 = arith.constant 0 : i32
    %0 = arith.cmpi eq, %arg1, %c0_i32 : i32
    %1 = arith.extui %0 : i1 to i32
    %c0_i32_0 = arith.constant 0 : i32
    %2 = arith.cmpi ne, %1, %c0_i32_0 : i32
    scf.if %2 {
      %cst = arith.constant 0.000000e+00 : f32
      %12 = vector.broadcast %cst : f32 to vector<16x128xf32>
      %c0 = arith.constant 0 : index
      %c0_5 = arith.constant 0 : index
      %13 = vector.load %arg5[%c0, %c0_5] : memref<16x128xf32, #tpu.memory_space<vmem>>, vector<16x128xf32>
      tpu.vector_store %arg5[%c0, %c0_5], %12 {strides = array<i32>} : memref<16x128xf32, #tpu.memory_space<vmem>>, vector<16x128xf32>,
    } else {
    }
    %c1_i32 = arith.constant 1 : i32
    %3 = arith.muli %arg0, %c1_i32 : i32
    %4 = arith.addi %3, %arg1 : i32
    %c16_i32 = arith.constant 16 : i32
    %5 = arith.muli %4, %c16_i32 : i32
    %c16_i32_1 = arith.constant 16 : i32
    %6 = arith.cmpi slt, %5, %c16_i32_1 : i32
    %7 = arith.extui %6 : i1 to i32
    %c0_i32_2 = arith.constant 0 : i32
    %8 = arith.cmpi ne, %7, %c0_i32_2 : i32
    scf.if %8 {
      %c0 = arith.constant 0 : index
      %c0_5 = arith.constant 0 : index
      %12 = vector.load %arg2[%c0, %c0_5] : memref<16x128xf32, #tpu.memory_space<vmem>>, vector<16x128xf32>
      %c0_6 = arith.constant 0 : index
      %c0_7 = arith.constant 0 : index
      %13 = vector.load %arg3[%c0_6, %c0_7] : memref<16x128xf32, #tpu.memory_space<vmem>>, vector<16x128xf32>
      %14 = math.log %12 : vector<16x128xf32>
      %cst = arith.constant -1.000000e+02 : f32
      %15 = vector.broadcast %cst : f32 to vector<16x128xf32>
      %16 = arith.maximumf %14, %15 : vector<16x128xf32>
      %cst_8 = arith.constant 1.000000e+00 : f32
      %17 = vector.broadcast %cst_8 : f32 to vector<16x128xf32>
      %18 = arith.subf %17, %12 : vector<16x128xf32>
      %19 = math.log %18 : vector<16x128xf32>
      %cst_9 = arith.constant -1.000000e+02 : f32
      %20 = vector.broadcast %cst_9 : f32 to vector<16x128xf32>
      %21 = arith.maximumf %19, %20 : vector<16x128xf32>
      %22 = arith.subf %16, %21 : vector<16x128xf32>
      %23 = arith.mulf %13, %22 : vector<16x128xf32>
      %24 = arith.addf %21, %23 : vector<16x128xf32>
      %cst_10 = arith.constant 0.000000e+00 : f32
      %25 = vector.broadcast %cst_10 : f32 to vector<16x128xf32>
      %26 = arith.subf %25, %24 : vector<16x128xf32>
      %27 = tpu.iota {dimensions = array<i32: 0>} : vector<16x128xi32>
      %28 = vector.broadcast %5 : i32 to vector<16x128xi32>
      %29 = arith.addi %28, %27 : vector<16x128xi32>
      %c16_i32_11 = arith.constant 16 : i32
      %30 = vector.broadcast %c16_i32_11 : i32 to vector<16x128xi32>
      %31 = arith.cmpi slt, %29, %30 : vector<16x128xi32>
      %c0_12 = arith.constant 0 : index
      %c0_13 = arith.constant 0 : index
      %32 = vector.load %arg5[%c0_12, %c0_13] : memref<16x128xf32, #tpu.memory_space<vmem>>, vector<16x128xf32>
      %cst_14 = arith.constant 0.000000e+00 : f32
      %33 = vector.broadcast %cst_14 : f32 to vector<16x128xf32>
      %34 = arith.select %31, %26, %33 : vector<16x128xi1>, vector<16x128xf32>
      %35 = arith.addf %32, %34 : vector<16x128xf32>
      %c0_15 = arith.constant 0 : index
      %c0_16 = arith.constant 0 : index
      %36 = vector.load %arg5[%c0_15, %c0_16] : memref<16x128xf32, #tpu.memory_space<vmem>>, vector<16x128xf32>
      tpu.vector_store %arg5[%c0_15, %c0_16], %35 {strides = array<i32>} : memref<16x128xf32, #tpu.memory_space<vmem>>, vector<16x128xf32>,
    } else {
    }
    %c0_i32_3 = arith.constant 0 : i32
    %9 = arith.cmpi eq, %arg1, %c0_i32_3 : i32
    %10 = arith.extui %9 : i1 to i32
    %c0_i32_4 = arith.constant 0 : i32
    %11 = arith.cmpi ne, %10, %c0_i32_4 : i32
    scf.if %11 {
      %c0 = arith.constant 0 : index
      %c0_5 = arith.constant 0 : index
      %12 = vector.load %arg5[%c0, %c0_5] : memref<16x128xf32, #tpu.memory_space<vmem>>, vector<16x128xf32>
      %13 = vector.shape_cast %12 : vector<16x128xf32> to vector<1x16x128xf32>
      %cst = arith.constant dense<0.000000e+00> : vector<1xf32>
      %14 = vector.multi_reduction <add>, %13, %cst [1, 2] : vector<1x16x128xf32> to vector<1xf32>
      %15 = vector.shape_cast %14 : vector<1xf32> to vector<1x1x1xf32>
      %16 = vector.extract %15[0, 0, 0] : f32 from vector<1x1x1xf32>
      %17 = vector.broadcast %16 : f32 to vector<1x8x128xf32>
      %c0_6 = arith.constant 0 : index
      %c0_7 = arith.constant 0 : index
      %c0_8 = arith.constant 0 : index
      %18 = vector.load %arg4[%c0_6, %c0_7, %c0_8] : memref<1x8x128xf32, #tpu.memory_space<vmem>>, vector<1x8x128xf32>
      tpu.vector_store %arg4[%c0_6, %c0_7, %c0_8], %17 {strides = array<i32>} : memref<1x8x128xf32, #tpu.memory_space<vmem>>, vector<1x8x128xf32>,
    } else {
    }
    return
  }
  func.func @transform_0(%arg0: i32, %arg1: i32) -> (i32, i32) {
    %c1_i32 = arith.constant 1 : i32
    %0 = arith.muli %arg0, %c1_i32 : i32
    %1 = arith.addi %0, %arg1 : i32
    %c0_i32 = arith.constant 0 : i32
    %2 = arith.minsi %1, %c0_i32 : i32
    %c0_i32_0 = arith.constant 0 : i32
    %c0_i32_1 = arith.constant 0 : i32
    return %2, %c0_i32_0 : i32, i32
  }
  func.func @transform_1(%arg0: i32, %arg1: i32) -> (i32, i32) {
    %c1_i32 = arith.constant 1 : i32
    %0 = arith.muli %arg0, %c1_i32 : i32
    %1 = arith.addi %0, %arg1 : i32
    %c0_i32 = arith.constant 0 : i32
    %2 = arith.minsi %1, %c0_i32 : i32
    %c0_i32_0 = arith.constant 0 : i32
    %c0_i32_1 = arith.constant 0 : i32
    return %2, %c0_i32_0 : i32, i32
  }
  func.func @transform_2(%arg0: i32, %arg1: i32) -> (i32, i32, i32) {
    %c0_i32 = arith.constant 0 : i32
    %c0_i32_0 = arith.constant 0 : i32
    %c0_i32_1 = arith.constant 0 : i32
    return %arg0, %c0_i32, %c0_i32_0 : i32, i32, i32
  }
}

</mosaic_0001>

<bundles_post_ra>
// kernel: tpu_custom_call.1
= control target key start
LH: loop header
LB: loop body
LE: loop exit
PB: predicated region body
PF: predicated region fallthrough
CT: control target
= control target key end

     0   :  { %7 = vsyncpa [#allocation4], 0  ;;  %s279_s0 = inlined_call_operand.hbm [shape: f32[16,128], index: 0, kind: input, shape index: {}]   ;;  %s280_s1 = inlined_call_operand.hbm [shape: f32[16,128], index: 1, kind: input, shape index: {}]   ;;  %s281_s2 = inlined_call_operand.hbm [shape: f32[1,8,128], index: 2, kind: output, shape index: {}]  }
   0x1   :  { %8 = vsyncpa [#allocation7], 0 }
   0x2   :  { %9 = vsyncpa [#allocation5], 0  ;;  %s20_s11 = sshll.u32 %s279_s0, 4  ;;  %s250_s12 = smov [#allocation3]   ;;  %s21_s11 = int_to_ptr.hbm [resolvable:$true] %s20_s11 }
   0x3   :  { %s22_s13 = sshll.u32 %s250_s12, 4  ;;  %s39_s16 = sshll.u32 %s280_s1, 4  ;;  %s23_s13 = int_to_ptr.vmem [resolvable:$true] %s22_s13  ;;  %s40_s16 = int_to_ptr.hbm [resolvable:$true] %s39_s16 }
   0x4   :  { %s251_s17 = smov 128   ;;  %s252_s18 = smov 8  }
   0x5   :  { %28 = dma.hbm_to_vmem [thread:$0]  %s21_s11, 256, %s23_s13, [#allocation4], %s251_s17, %s251_s17, %s252_s18  }
   0x6   :  { %s253_s19 = smov [#allocation6]  }
   0x7   :  { %s41_s20 = sshll.u32 %s253_s19, 4  ;;  %s42_s20 = int_to_ptr.vmem [resolvable:$true] %s41_s20 }
   0x8   :  { %47 = dma.hbm_to_vmem [thread:$0]  %s40_s16, 256, %s42_s20, [#allocation7], %s251_s17, %s251_s17, %s252_s18  }
   0x9   :  { %244 = dma.done.wait [#allocation4], 256  }
   0xa   :  { %245 = vsyncadd [#allocation4], 4294967040 }
   0xb   :  { %246 = dma.done.wait [#allocation7], 256  }
   0xc   :  { %247 = vsyncadd [#allocation7], 4294967040  ;;  %v76_v0 = vld [vmem:[#allocation3] sm:$0xff]  ;;  %v77_v1 = vld [vmem:[#allocation3 + $0x8] sm:$0xff]  ;;  %s254_s0 = smov [#allocation8]   ;;  %s142_s23 = sshll.u32 %s281_s2, 4  ;;  %s143_s23 = int_to_ptr.hbm [resolvable:$true] %s142_s23 }
   0xd   :  { %164 = vlog2.f32 %v76_v0  ;;  %v86_v2 = vsub.f32 1.0, %v76_v0  ;;  %v87_v3 = vsub.f32 1.0, %v77_v1  ;;  %v78_v15 = vld [vmem:[#allocation6] sm:$0xff]  ;;  %v79_v17 = vld [vmem:[#allocation6 + $0x8] sm:$0xff]  ;;  %s140_s1 = sshll.u32 %s254_s0, 4  ;;  %s141_s1 = int_to_ptr.vmem [resolvable:$true] %s140_s1 }
   0xe   :  { %166 = vlog2.f32 %v77_v1 }
   0xf   :  { %168 = vlog2.f32 %v86_v2 }
  0x10   :  { %170 = vlog2.f32 %v87_v3 }
  0x13   :  { %v165_v4 = vpop.eup %164 }
  0x14   :  { %v167_v5 = vpop.eup %166  ;;  %v81_v6 = vmul.f32 0.6931472, %v165_v4 }
  0x15   :  { %v169_v7 = vpop.eup %168  ;;  %v83_v8 = vmul.f32 0.6931472, %v167_v5 }
  0x16   :  { %v171_v9 = vpop.eup %170  ;;  %v84_v10 = vmax.f32 %v81_v6, -100.0  ;;  %v89_v11 = vmul.f32 0.6931472, %v169_v7 }
  0x17   :  { %v85_v12 = vmax.f32 %v83_v8, -100.0  ;;  %v91_v13 = vmul.f32 0.6931472, %v171_v9 }
  0x18   :  { %v92_v14 = vmax.f32 %v89_v11, -100.0 }
  0x19   :  { %v93_v16 = vmax.f32 %v91_v13, -100.0 }
  0x1a   :  { %v94_v18 = vsub.f32 %v84_v10, %v92_v14 }
  0x1b   :  { %v95_v19 = vsub.f32 %v85_v12, %v93_v16 }
  0x1c   :  { %v96_v20 = vmul.f32 %v94_v18, %v78_v15 }
  0x1d   :  { %v97_v21 = vmul.f32 %v95_v19, %v79_v17 }
  0x1e   :  { %v98_v22 = vadd.f32 %v96_v20, %v92_v14 }
  0x1f   :  { %v99_v23 = vadd.f32 %v97_v21, %v93_v16 }
  0x20   :  { %v100_v24 = vsub.f32 0.0, %v98_v22 }
  0x21   :  { %v101_v25 = vsub.f32 0.0, %v99_v23 }
  0x23   :  { %v123_v26 = vadd.f32 %v101_v25, %v100_v24 }
  0x25   :  { %124 = vadd.xlane.f32.xlu0 %v123_v26 }
  0x98   :  { %v125_v27 = vpop.xlane.xlu0 %124 }
  0x99   :  { %v126_v28 = vrot.slane %v125_v27, 4 }
  0x9b   :  { %v127_v29 = vadd.f32 %v126_v28, %v125_v27 }
  0x9d   :  { %v128_v30 = vrot.slane %v127_v29, 2 }
  0x9f   :  { %v129_v31 = vadd.f32 %v128_v30, %v127_v29 }
  0xa1   :  { %v130_v32 = vrot.slane %v129_v31, 1 }
  0xa3   :  { %v131_v33 = vadd.f32 %v130_v32, %v129_v31 }
  0xa5   :  { %157 = vpush %v131_v33 }
  0xd6   :  { %s158_s24 = spop %157 }
  0xd7   :  { %v133_v34 = vstv %s158_s24 }
  0xd8   :  { %134 = vst [vmem:[#allocation8] sm:$0xff] %v133_v34 }
  0xd9   :  { %145 = dma.vmem_to_hbm [thread:$0]  %s141_s1, 128, %s143_s23, [#allocation5]  }
  0xda   :  { %248 = dma.done.wait [#allocation5], 128  }
  0xdb   :  { %249 = vsyncadd [#allocation5], 4294967168 }
  0xdc   :  { %150 = vsyncpa [#allocation4], 1 }
  0xdd   :  { %151 = vsyncpa [#allocation7], 1 }
  0xde   :  { %152 = vsyncpa [#allocation5], 1 }

</bundles_post_ra>
